<compile_context>
chip_gen: v7x
topology: tpu7x:2x2x1
jax: 0.10.0
libtpu: 0.0.40
codegen_flags: <defaults>
</compile_context>

<pallas_src>
import jax
import jax.numpy as jnp
from jax.experimental import pallas as pl
from jax.experimental.pallas import tpu as pltpu

INPUT_DIM = 89
HIDDEN = 128
NUM_CLASSES = 2
TB_MAX = 2048  # rows per batch tile (multiple of 8)


def fused_mlp_kernel(x_ref, w_ref, b_ref, o_ref):
    # Single fused (TB, 89) @ (89, 2) matmul on the MXU, f32 accumulate.
    y = jnp.dot(x_ref[...], w_ref[...], preferred_element_type=jnp.float32)
    # Bias (1, 2) broadcasts over the batch rows; sigmoid on VPU/EUP.
    o_ref[...] = jax.nn.sigmoid(y + b_ref[...])


def _fuse_weights(w1, b1, w2, b2):
    """Fold Linear(89->128) and Linear(128->2) into one affine map (no ReLU)."""
    w_fused = w1 @ w2                    # (89, 2)
    b_fused = b1 @ w2 + b2               # (1, 2)
    return w_fused, b_fused


def top_model_forward(x, w1, b1, w2, b2):
    """x: (B, 89) f32; w1: (89,128); b1: (1,128); w2: (128,2); b2: (1,2)."""
    x = x.astype(jnp.float32)
    w_fused, b_fused = _fuse_weights(w1, b1, w2, b2)

    B = x.shape[0]
    # Tile size: multiple of 8, no larger than TB_MAX, no larger than needed.
    tb = min(TB_MAX, max(8, ((B + 7) // 8) * 8))
    # Pad the batch up to a multiple of tb (padded rows are discarded below).
    b_pad = ((B + tb - 1) // tb) * tb
    if b_pad != B:
        x = jnp.pad(x, ((0, b_pad - B), (0, 0)))
    grid = (b_pad // tb,)

    out = pl.pallas_call(
        fused_mlp_kernel,
        out_shape=jax.ShapeDtypeStruct((b_pad, NUM_CLASSES), jnp.float32),
        grid=grid,
        in_specs=[
            # x: one contiguous (tb, 89) tile per grid step (full feature width).
            pl.BlockSpec((tb, INPUT_DIM), lambda i: (i, 0)),
            # Fused weight / bias: tiny, resident, same block every step.
            pl.BlockSpec((INPUT_DIM, NUM_CLASSES), lambda i: (0, 0)),
            pl.BlockSpec((1, NUM_CLASSES), lambda i: (0, 0)),
        ],
        out_specs=pl.BlockSpec((tb, NUM_CLASSES), lambda i: (i, 0)),
        compiler_params=pltpu.CompilerParams(
            # Batch tiles are independent -> shard across v7x's 2 TensorCores.
            dimension_semantics=("parallel",),
            # ~1.5 MiB actually used; 32 MiB is safe on v5e/v6e/v7x.
            vmem_limit_bytes=32 * 1024 * 1024,
        ),
    )(x, w_fused, b_fused)

    out = out[:B]
    # Match torch's .squeeze() semantics (drops any size-1 dims).
    return jnp.squeeze(out)


def init_params(key):
    """Deterministic init mimicking nn.Linear's uniform(-1/sqrt(fan_in), +)."""
    k1, k2, k3, k4 = jax.random.split(key, 4)
    bound1 = 1.0 / jnp.sqrt(INPUT_DIM)
    bound2 = 1.0 / jnp.sqrt(HIDDEN)
    # Stored as (in, out) == transpose of PyTorch's (out, in) weight layout.
    w1 = jax.random.uniform(k1, (INPUT_DIM, HIDDEN), jnp.float32, -bound1, bound1)
    b1 = jax.random.uniform(k2, (1, HIDDEN), jnp.float32, -bound1, bound1)
    w2 = jax.random.uniform(k3, (HIDDEN, NUM_CLASSES), jnp.float32, -bound2, bound2)
    b2 = jax.random.uniform(k4, (1, NUM_CLASSES), jnp.float32, -bound2, bound2)
    return w1, b1, w2, b2


def _reference(x, w1, b1, w2, b2):
    """Plain-JAX reference with the exact (unfused) PyTorch math."""
    return jnp.squeeze(jax.nn.sigmoid((x @ w1 + b1) @ w2 + b2))


if __name__ == "__main__":
    key = jax.random.PRNGKey(0)
    kx, kp, kx2 = jax.random.split(key, 3)
    w1, b1, w2, b2 = init_params(kp)

    # Small-batch check (single tile).
    B = 8
    x = jax.random.normal(kx, (B, INPUT_DIM), jnp.float32)
    out = top_model_forward(x, w1, b1, w2, b2)
    jax.block_until_ready(out)
    ref = _reference(x, w1, b1, w2, b2)
    assert out.shape == ref.shape == (B, NUM_CLASSES)
    assert jnp.allclose(out, ref, atol=1e-5, rtol=1e-5)

    # Multi-tile check: exercises the batch grid + tail padding path.
    B2 = 4100  # -> 3 grid steps of tb=2048 with a padded tail
    x2 = jax.random.normal(kx2, (B2, INPUT_DIM), jnp.float32)
    out2 = top_model_forward(x2, w1, b1, w2, b2)
    jax.block_until_ready(out2)
    ref2 = _reference(x2, w1, b1, w2, b2)
    assert out2.shape == ref2.shape == (B2, NUM_CLASSES)
    assert jnp.allclose(out2, ref2, atol=1e-5, rtol=1e-5)

    print("KERNEL_OK")
</pallas_src>

<mosaic_0001>
module attributes {stable_mosaic.version = 11 : i64} {
  func.func @fused_mlp_kernel(%arg0: i32, %arg1: memref<8x89xf32, #tpu.memory_space<vmem>>, %arg2: memref<89x2xf32, #tpu.memory_space<vmem>>, %arg3: memref<1x2xf32, #tpu.memory_space<vmem>>, %arg4: memref<8x2xf32, #tpu.memory_space<vmem>>) attributes {dimension_semantics = [#tpu.dimension_semantics<parallel>], iteration_bounds = array<i64: 1>, scalar_prefetch = 0 : i64, scratch_operands = 0 : i64, tpu.core_type = #tpu.core_type<tc>, window_params = [{transform_indices = @transform_0, window_bounds = array<i64: 8, 89>}, {pipeline_mode = #tpu.pipeline_mode<synchronous>, transform_indices = @transform_1, window_bounds = array<i64: 89, 2>}, {pipeline_mode = #tpu.pipeline_mode<synchronous>, transform_indices = @transform_2, window_bounds = array<i64: 1, 2>}, {transform_indices = @transform_3, window_bounds = array<i64: 8, 2>}]} {
    %c0 = arith.constant 0 : index
    %c0_0 = arith.constant 0 : index
    %0 = vector.load %arg1[%c0, %c0_0] : memref<8x89xf32, #tpu.memory_space<vmem>>, vector<8x89xf32>
    %c0_1 = arith.constant 0 : index
    %c0_2 = arith.constant 0 : index
    %1 = vector.load %arg2[%c0_1, %c0_2] : memref<89x2xf32, #tpu.memory_space<vmem>>, vector<89x2xf32>
    %cst = arith.constant dense<0.000000e+00> : vector<8x2xf32>
    %2 = tpu.matmul %0, %1, %cst {dimension_numbers = #tpu.dot_dimension_numbers<[1], [0], [0], [1], [0, 0, 1, 1], [], []>} : vector<8x89xf32>, vector<89x2xf32>, vector<8x2xf32> -> vector<8x2xf32>
    %c0_3 = arith.constant 0 : index
    %c0_4 = arith.constant 0 : index
    %3 = vector.load %arg3[%c0_3, %c0_4] : memref<1x2xf32, #tpu.memory_space<vmem>>, vector<1x2xf32>
    %4 = vector.broadcast %3 : vector<1x2xf32> to vector<8x2xf32>
    %5 = arith.addf %2, %4 : vector<8x2xf32>
    %6 = arith.negf %5 : vector<8x2xf32>
    %7 = math.exp %6 : vector<8x2xf32>
    %cst_5 = arith.constant 1.000000e+00 : f32
    %8 = vector.broadcast %cst_5 : f32 to vector<8x2xf32>
    %9 = arith.addf %8, %7 : vector<8x2xf32>
    %10 = arith.divf %8, %9 : vector<8x2xf32>
    %c0_6 = arith.constant 0 : index
    %c0_7 = arith.constant 0 : index
    %11 = vector.load %arg4[%c0_6, %c0_7] : memref<8x2xf32, #tpu.memory_space<vmem>>, vector<8x2xf32>
    tpu.vector_store %arg4[%c0_6, %c0_7], %10 {strides = array<i32>} : memref<8x2xf32, #tpu.memory_space<vmem>>, vector<8x2xf32>,
    return
  }
  func.func @transform_0(%arg0: i32) -> (i32, i32) {
    %c0_i32 = arith.constant 0 : i32
    %c0_i32_0 = arith.constant 0 : i32
    return %arg0, %c0_i32 : i32, i32
  }
  func.func @transform_1(%arg0: i32) -> (i32, i32) {
    %c0_i32 = arith.constant 0 : i32
    %c0_i32_0 = arith.constant 0 : i32
    %c0_i32_1 = arith.constant 0 : i32
    return %c0_i32, %c0_i32_0 : i32, i32
  }
  func.func @transform_2(%arg0: i32) -> (i32, i32) {
    %c0_i32 = arith.constant 0 : i32
    %c0_i32_0 = arith.constant 0 : i32
    %c0_i32_1 = arith.constant 0 : i32
    return %c0_i32, %c0_i32_0 : i32, i32
  }
  func.func @transform_3(%arg0: i32) -> (i32, i32) {
    %c0_i32 = arith.constant 0 : i32
    %c0_i32_0 = arith.constant 0 : i32
    return %arg0, %c0_i32 : i32, i32
  }
}

</mosaic_0001>

<bundles_post_ra>
// kernel: tpu_custom_call.1
= control target key start
LH: loop header
LB: loop body
LE: loop exit
PB: predicated region body
PF: predicated region fallthrough
CT: control target
= control target key end

     0   :  { %v195_v0 = vmov 0.0|0.0   ;;  %vm196_vm0 = vmmov 0   ;;  %v197_v6 = vmov 0.0   ;;  %vm38_vm1 = vcmask 1040384   ;;  %s264_s1 = inlined_call_operand.vmem [shape: f32[89,2], index: 1, kind: input, shape index: {}]   ;;  %s265_s0 = inlined_call_operand.vmem [shape: f32[8,89], index: 0, kind: input, shape index: {}]   ;;  %s266_s2 = inlined_call_operand.vmem [shape: f32[1,2], index: 2, kind: input, shape index: {}]   ;;  %s267_s3 = inlined_call_operand.vmem [shape: f32[8,2], index: 3, kind: output, shape index: {}]  }
   0x1   :  { %168 = vmatprep.subr.bf16.mxu0 %v195_v0  ;;  %v15_v1 = vld [vmem:[%s264_s1] sm:$0xff]  ;;  %v16_v2 = vld [vmem:[%s264_s1 + $0x8] sm:$0xff]  ;;  %v17_v3 = vld [vmem:[%s264_s1 + $0x10] sm:$0xff]  ;;  %165 = vmatprep.mubr.msk.f32.mxu0 %vm196_vm0, %v197_v6  ;;  %vm198_vm2 = vmmov 1   ;;  %vm34_vm4 = vcmask 728064   ;;  %vm118_vm5 = vcmask 15360  }
   0x2   :  { %v169_v4 = vpack.c.bf16 %v16_v2, %v15_v1  ;;  %v18_v5 = vld [vmem:[%s264_s1 + $0x18] sm:$0xff]  ;;  %v19_v8 = vld [vmem:[%s264_s1 + $0x20] sm:$0xff]  ;;  %v20_v9 = vld [vmem:[%s264_s1 + $0x28] sm:$0xff] }
   0x3   :  { %v172_v7 = vpack.c.bf16 %v18_v5, %v17_v3  ;;  %v175_v10 = vpack.c.bf16 %v20_v9, %v19_v8  ;;  %v21_v11 = vld [vmem:[%s264_s1 + $0x30] sm:$0xff]  ;;  %v22_v12 = vld [vmem:[%s264_s1 + $0x38] sm:$0xff]  ;;  %v23_v14 = vld [vmem:[%s264_s1 + $0x40] sm:$0xff] }
   0x4   :  { %170 = vmatpush3.bf16.msra.mxu0 %v169_v4  ;;  %v178_v13 = vpack.c.bf16 %v22_v12, %v21_v11  ;;  %v24_v15 = vld [vmem:[%s264_s1 + $0x48] sm:$0xff]  ;;  %v25_v17 = vld [vmem:[%s264_s1 + $0x50] sm:$0xff]  ;;  %v26_v18 = vld [vmem:[%s264_s1 + $0x58] sm:$0x1] }
   0x5   :  { %171 = vmatprep.subr.bf16.mxu0 %v195_v0  ;;  %v181_v16 = vpack.c.bf16 %v24_v15, %v23_v14  ;;  %v184_v19 = vpack.c.bf16 %v26_v18, %v25_v17  ;;  %vm185_vm3 = vmpackc.low %vm38_vm1, %vm198_vm2  ;;  %v14_v20 = vld [vmem:[%s265_s0] sm:$0xff] }
   0x6   :  { %v124_v21 = vld [vmem:[%s266_s2] ss:$0 sm:$0xff] }
   0x8   :  { %173 = vmatpush3.bf16.msra.mxu0 %v172_v7 }
   0x9   :  { %174 = vmatprep.subr.bf16.mxu0 %v195_v0 }
   0xc   :  { %176 = vmatpush3.bf16.msra.mxu0 %v175_v10 }
   0xd   :  { %177 = vmatprep.subr.bf16.mxu0 %v195_v0 }
  0x10   :  { %179 = vmatpush3.bf16.msra.mxu0 %v178_v13 }
  0x11   :  { %180 = vmatprep.subr.bf16.mxu0 %v195_v0 }
  0x14   :  { %182 = vmatpush3.bf16.msra.mxu0 %v181_v16 }
  0x15   :  { %183 = vmatprep.subr.bf16.mxu0 %v195_v0 }
  0x18   :  { %186 = vmatpush3.bf16.msk.msra.mxu0 %vm185_vm3, %v184_v19 }
  0x1b   :  { %166 = vmatmul.mubr.msk.f32.vlgmr.msra.gmra.mrb[0].mxu0 %vm34_vm4, %v14_v20 }
  0xee   :  { %v108_v22 = vpop.f32.mrb[0].mxu0 }
  0xef   :  { %v109_v23 = vadd.f32 %v124_v21, %v108_v22  ;;  %v167_v24 = vpop.f32.mrb[1].mxu0 }
  0xf1   :  { %v127_v25 = vmul.f32 -1.442695, %v109_v23 }
  0xf3   :  { %191 = vpow2.f32 %v127_v25 }
  0xfd   :  { %v192_v26 = vpop.eup %191 }
  0xfe   :  { %v115_v27 = vadd.f32 1.0, %v192_v26 }
 0x100   :  { %193 = vrcp.f32 %v115_v27 }
 0x10a   :  { %v194_v28 = vpop.eup %193 }
 0x10b   :  { %119 = vst.msk [vmem:[%s267_s3] sm:$0xff] %vm118_vm5, %v194_v28 }

</bundles_post_ra>
